<compile_context>
chip_gen: v7x
topology: tpu7x:2x2x1
jax: 0.10.0
libtpu: 0.0.40
codegen_flags: <defaults>
</compile_context>

<pallas_src>
import jax
import jax.numpy as jnp
from jax.experimental import pallas as pl
from jax.experimental.pallas import tpu as pltpu


# ----------------------- tiled matmul + bias (MXU) --------------------------

def matmul_bias_kernel(x_ref, w_ref, b_ref, o_ref, acc_ref):
    k = pl.program_id(2)

    @pl.when(k == 0)
    def _():
        acc_ref[...] = jnp.zeros_like(acc_ref)

    acc_ref[...] += jnp.dot(x_ref[...], w_ref[...],
                            preferred_element_type=jnp.float32)

    @pl.when(k == pl.num_programs(2) - 1)
    def _():
        o_ref[...] = (acc_ref[...] + b_ref[...]).astype(o_ref.dtype)


def matmul_bias(x, w, b, *, tm=256, tn=256, tk=512):
    """(M, K) @ (K, N) + (1, N) -> (M, N) float32, tiled over (M, N, K)."""
    M, K = x.shape
    N = w.shape[-1]
    tm, tn, tk = min(tm, M), min(tn, N), min(tk, K)
    if K % tk != 0:              # keep K untiled unless it divides evenly
        tk = K
    grid = (pl.cdiv(M, tm), pl.cdiv(N, tn), pl.cdiv(K, tk))
    cost = pl.CostEstimate(flops=2 * M * N * K, transcendentals=0,
                           bytes_accessed=4 * (M * K + K * N + M * N + N))
    return pl.pallas_call(
        matmul_bias_kernel,
        out_shape=jax.ShapeDtypeStruct((M, N), jnp.float32),
        grid_spec=pltpu.PrefetchScalarGridSpec(
            num_scalar_prefetch=0,
            grid=grid,
            in_specs=[
                pl.BlockSpec((tm, tk), lambda i, j, k: (i, k)),
                pl.BlockSpec((tk, tn), lambda i, j, k: (k, j)),
                pl.BlockSpec((1, tn), lambda i, j, k: (0, j)),
            ],
            out_specs=pl.BlockSpec((tm, tn), lambda i, j, k: (i, j)),
            scratch_shapes=[pltpu.VMEM((tm, tn), jnp.float32)],
        ),
        compiler_params=pltpu.CompilerParams(
            dimension_semantics=("parallel", "parallel", "arbitrary"),
            vmem_limit_bytes=32 * 1024 * 1024,
        ),
        cost_estimate=cost,
    )(x, w, b)


# -------------------------- LSTM recurrence kernel ---------------------------

def lstm_recurrence_kernel(xproj_ref, whh_ref, out_ref):
    """Serial LSTM recurrence over time for one batch tile.

    xproj_ref: (T, Bt, 4H)  precomputed x_t @ Wih + (b_ih + b_hh), gates [i|f|g|o]
    whh_ref:   (H, 4H)      fused hidden->gate weights
    out_ref:   (T, Bt, H)   per-step hidden states
    """
    T, Bt, G = xproj_ref.shape
    H = G // 4
    whh = whh_ref[...]                       # hoisted: loaded once, reused T times

    def step(t, carry):
        h, c = carry
        # Only the h-matmul is on the serial critical path (single 4H-wide matmul).
        pre = xproj_ref[t] + jnp.dot(h, whh, preferred_element_type=jnp.float32)
        i_g = jax.nn.sigmoid(pre[:, 0 * H:1 * H])
        f_g = jax.nn.sigmoid(pre[:, 1 * H:2 * H])
        g_g = jnp.tanh(pre[:, 2 * H:3 * H])
        o_g = jax.nn.sigmoid(pre[:, 3 * H:4 * H])
        c_new = f_g * c + i_g * g_g
        h_new = o_g * jnp.tanh(c_new)
        out_ref[t] = h_new
        return (h_new, c_new)

    zero = jnp.zeros((Bt, H), jnp.float32)   # h/c stay vreg-resident as carries
    unroll = True if T <= 32 else 4          # give LLO cross-step visibility
    jax.lax.fori_loop(0, T, step, (zero, zero), unroll=unroll)


def lstm_recurrence(xproj, whh, *, b_tile=None):
    T, B, G = xproj.shape
    H = G // 4
    if b_tile is None:
        b_tile = B if B <= 8 else 8          # batch rows are independent
    grid = (pl.cdiv(B, b_tile),)
    return pl.pallas_call(
        lstm_recurrence_kernel,
        out_shape=jax.ShapeDtypeStruct((T, B, H), jnp.float32),
        grid_spec=pltpu.PrefetchScalarGridSpec(
            num_scalar_prefetch=0,
            grid=grid,
            in_specs=[
                pl.BlockSpec((T, b_tile, G), lambda b: (0, b, 0)),
                pl.BlockSpec((H, G), lambda b: (0, 0)),   # weights stay resident
            ],
            out_specs=pl.BlockSpec((T, b_tile, H), lambda b: (0, b, 0)),
        ),
        compiler_params=pltpu.CompilerParams(
            dimension_semantics=("parallel",),            # megacore over batch tiles
            vmem_limit_bytes=32 * 1024 * 1024,
        ),
    )(xproj, whh)


# ------------------------------ model wrapper --------------------------------

def char_lstm_forward(tokens, params):
    """tokens: (B, T) int32 -> logits (B, T, vocab) float32 (PyTorch batch_first)."""
    emb = params["embedding"]                 # (V, E)
    # TODO(synk): embedding gather kept as plain-JAX glue (data-dependent gather;
    # no rectangular-DMA win at these sizes) — everything downstream is Pallas.
    x = jnp.take(emb, tokens, axis=0)         # (B, T, E)
    x = jnp.transpose(x, (1, 0, 2))           # time-major (T, B, E)
    T, B, _ = x.shape
    for layer in params["lstm"]:
        wih, whh, b = layer["wih"], layer["whh"], layer["b"]
        d_in = wih.shape[0]
        H = whh.shape[0]
        # Hoisted input projection: ONE big matmul with M = T*B, N = 4H.
        xproj = matmul_bias(x.reshape(T * B, d_in), wih, b)       # (T*B, 4H)
        # Serial recurrence (only h @ Whh per step inside the loop).
        x = lstm_recurrence(xproj.reshape(T, B, 4 * H), whh)      # (T, B, H)
    H = x.shape[-1]
    logits = matmul_bias(x.reshape(T * B, H), params["fc_w"], params["fc_b"])
    V = logits.shape[-1]
    return jnp.transpose(logits.reshape(T, B, V), (1, 0, 2))      # (B, T, V)


# --------------------------- pure-JAX reference ------------------------------

def reference_forward(tokens, params):
    x = params["embedding"][tokens]           # (B, T, E)
    B, T, _ = x.shape
    for layer in params["lstm"]:
        wih, whh, b = layer["wih"], layer["whh"], layer["b"]
        H = whh.shape[0]
        h = jnp.zeros((B, H), jnp.float32)
        c = jnp.zeros((B, H), jnp.float32)
        outs = []
        for t in range(T):
            pre = x[:, t, :] @ wih + h @ whh + b
            i_g = jax.nn.sigmoid(pre[:, 0 * H:1 * H])
            f_g = jax.nn.sigmoid(pre[:, 1 * H:2 * H])
            g_g = jnp.tanh(pre[:, 2 * H:3 * H])
            o_g = jax.nn.sigmoid(pre[:, 3 * H:4 * H])
            c = f_g * c + i_g * g_g
            h = o_g * jnp.tanh(c)
            outs.append(h)
        x = jnp.stack(outs, axis=1)           # (B, T, H)
    return x @ params["fc_w"] + params["fc_b"]


# ----------------------------- parameter init --------------------------------

def init_params(key, vocab_size, embed_dim, hidden_size, num_layers):
    keys = jax.random.split(key, 3 + num_layers)
    s = 0.1
    params = {
        "embedding": s * jax.random.normal(keys[0], (vocab_size, embed_dim), jnp.float32),
        "fc_w": s * jax.random.normal(keys[1], (hidden_size, vocab_size), jnp.float32),
        "fc_b": s * jax.random.normal(keys[2], (1, vocab_size), jnp.float32),
        "lstm": [],
    }
    for l in range(num_layers):
        in_dim = embed_dim if l == 0 else hidden_size
        k1, k2, k3, k4 = jax.random.split(keys[3 + l], 4)
        params["lstm"].append({
            # Fused gate weights; columns in PyTorch order [i | f | g | o].
            "wih": s * jax.random.normal(k1, (in_dim, 4 * hidden_size), jnp.float32),
            "whh": s * jax.random.normal(k2, (hidden_size, 4 * hidden_size), jnp.float32),
            # b = b_ih + b_hh (their sum is mathematically identical to PyTorch).
            "b": s * (jax.random.normal(k3, (1, 4 * hidden_size), jnp.float32)
                      + jax.random.normal(k4, (1, 4 * hidden_size), jnp.float32)),
        })
    return params


if __name__ == "__main__":
    vocab_size, embed_dim, hidden_size, num_layers = 32, 16, 32, 2
    batch, seq = 2, 8

    key = jax.random.PRNGKey(0)
    pkey, xkey = jax.random.split(key)
    params = init_params(pkey, vocab_size, embed_dim, hidden_size, num_layers)
    tokens = jax.random.randint(xkey, (batch, seq), 0, vocab_size, dtype=jnp.int32)

    logits = jax.block_until_ready(char_lstm_forward(tokens, params))
    ref = jax.block_until_ready(reference_forward(tokens, params))

    assert logits.shape == (batch, seq, vocab_size), logits.shape
    assert logits.dtype == jnp.float32
    assert bool(jnp.allclose(logits, ref, atol=1e-3, rtol=1e-3))
    print("KERNEL_OK")
</pallas_src>

<mosaic_0001>
module attributes {stable_mosaic.version = 11 : i64} {
  func.func @matmul_bias_kernel(%arg0: i32, %arg1: i32, %arg2: i32, %arg3: memref<16x16xf32, #tpu.memory_space<vmem>>, %arg4: memref<16x128xf32, #tpu.memory_space<vmem>>, %arg5: memref<1x128xf32, #tpu.memory_space<vmem>>, %arg6: memref<16x128xf32, #tpu.memory_space<vmem>>, %arg7: memref<16x128xf32, #tpu.memory_space<vmem>>) attributes {dimension_semantics = [#tpu.dimension_semantics<parallel>, #tpu.dimension_semantics<parallel>, #tpu.dimension_semantics<arbitrary>], iteration_bounds = array<i64: 1, 1, 1>, scalar_prefetch = 0 : i64, scratch_operands = 1 : i64, tpu.core_type = #tpu.core_type<tc>, window_params = [{transform_indices = @transform_0, window_bounds = array<i64: 16, 16>}, {transform_indices = @transform_1, window_bounds = array<i64: 16, 128>}, {transform_indices = @transform_2, window_bounds = array<i64: 1, 128>}, {transform_indices = @transform_3, window_bounds = array<i64: 16, 128>}]} {
    %c0_i32 = arith.constant 0 : i32
    %0 = arith.cmpi eq, %arg2, %c0_i32 : i32
    %1 = arith.extui %0 : i1 to i32
    %c0_i32_0 = arith.constant 0 : i32
    %2 = arith.cmpi ne, %1, %c0_i32_0 : i32
    scf.if %2 {
      %cst_10 = arith.constant 0.000000e+00 : f32
      %12 = vector.broadcast %cst_10 : f32 to vector<16x128xf32>
      %c0_11 = arith.constant 0 : index
      %c0_12 = arith.constant 0 : index
      %13 = vector.load %arg7[%c0_11, %c0_12] : memref<16x128xf32, #tpu.memory_space<vmem>>, vector<16x128xf32>
      tpu.vector_store %arg7[%c0_11, %c0_12], %12 {strides = array<i32>} : memref<16x128xf32, #tpu.memory_space<vmem>>, vector<16x128xf32>,
    } else {
    }
    %c0 = arith.constant 0 : index
    %c0_1 = arith.constant 0 : index
    %3 = vector.load %arg7[%c0, %c0_1] : memref<16x128xf32, #tpu.memory_space<vmem>>, vector<16x128xf32>
    %c0_2 = arith.constant 0 : index
    %c0_3 = arith.constant 0 : index
    %4 = vector.load %arg3[%c0_2, %c0_3] : memref<16x16xf32, #tpu.memory_space<vmem>>, vector<16x16xf32>
    %c0_4 = arith.constant 0 : index
    %c0_5 = arith.constant 0 : index
    %5 = vector.load %arg4[%c0_4, %c0_5] : memref<16x128xf32, #tpu.memory_space<vmem>>, vector<16x128xf32>
    %cst = arith.constant dense<0.000000e+00> : vector<16x128xf32>
    %6 = tpu.matmul %4, %5, %cst {dimension_numbers = #tpu.dot_dimension_numbers<[1], [0], [0], [1], [0, 0, 1, 1], [], []>} : vector<16x16xf32>, vector<16x128xf32>, vector<16x128xf32> -> vector<16x128xf32>
    %7 = arith.addf %3, %6 : vector<16x128xf32>
    %c0_6 = arith.constant 0 : index
    %c0_7 = arith.constant 0 : index
    %8 = vector.load %arg7[%c0_6, %c0_7] : memref<16x128xf32, #tpu.memory_space<vmem>>, vector<16x128xf32>
    tpu.vector_store %arg7[%c0_6, %c0_7], %7 {strides = array<i32>} : memref<16x128xf32, #tpu.memory_space<vmem>>, vector<16x128xf32>,
    %c0_i32_8 = arith.constant 0 : i32
    %9 = arith.cmpi eq, %arg2, %c0_i32_8 : i32
    %10 = arith.extui %9 : i1 to i32
    %c0_i32_9 = arith.constant 0 : i32
    %11 = arith.cmpi ne, %10, %c0_i32_9 : i32
    scf.if %11 {
      %c0_10 = arith.constant 0 : index
      %c0_11 = arith.constant 0 : index
      %12 = vector.load %arg7[%c0_10, %c0_11] : memref<16x128xf32, #tpu.memory_space<vmem>>, vector<16x128xf32>
      %c0_12 = arith.constant 0 : index
      %c0_13 = arith.constant 0 : index
      %13 = vector.load %arg5[%c0_12, %c0_13] : memref<1x128xf32, #tpu.memory_space<vmem>>, vector<1x128xf32>
      %14 = vector.broadcast %13 : vector<1x128xf32> to vector<16x128xf32>
      %15 = arith.addf %12, %14 : vector<16x128xf32>
      %c0_14 = arith.constant 0 : index
      %c0_15 = arith.constant 0 : index
      %16 = vector.load %arg6[%c0_14, %c0_15] : memref<16x128xf32, #tpu.memory_space<vmem>>, vector<16x128xf32>
      tpu.vector_store %arg6[%c0_14, %c0_15], %15 {strides = array<i32>} : memref<16x128xf32, #tpu.memory_space<vmem>>, vector<16x128xf32>,
    } else {
    }
    return
  }
  func.func @transform_0(%arg0: i32, %arg1: i32, %arg2: i32) -> (i32, i32) {
    %c0_i32 = arith.constant 0 : i32
    return %arg0, %arg2 : i32, i32
  }
  func.func @transform_1(%arg0: i32, %arg1: i32, %arg2: i32) -> (i32, i32) {
    %c0_i32 = arith.constant 0 : i32
    return %arg2, %arg1 : i32, i32
  }
  func.func @transform_2(%arg0: i32, %arg1: i32, %arg2: i32) -> (i32, i32) {
    %c0_i32 = arith.constant 0 : i32
    %c0_i32_0 = arith.constant 0 : i32
    return %c0_i32, %arg1 : i32, i32
  }
  func.func @transform_3(%arg0: i32, %arg1: i32, %arg2: i32) -> (i32, i32) {
    %c0_i32 = arith.constant 0 : i32
    return %arg0, %arg1 : i32, i32
  }
}

</mosaic_0001>

<bundles_post_ra>
// kernel: tpu_custom_call.1
= control target key start
LH: loop header
LB: loop body
LE: loop exit
PB: predicated region body
PF: predicated region fallthrough
CT: control target
= control target key end

     0   :  { %8 = vsyncpa [#allocation4], 0  ;;  %s343_s0 = inlined_call_operand.hbm [shape: f32[16,16], index: 0, kind: input, shape index: {}]   ;;  %s344_s1 = inlined_call_operand.hbm [shape: f32[16,128], index: 1, kind: input, shape index: {}]   ;;  %s345_s2 = inlined_call_operand.vmem [shape: f32[1,128], index: 2, kind: input, shape index: {}]   ;;  %s346_s3 = inlined_call_operand.hbm [shape: f32[16,128], index: 3, kind: output, shape index: {}]  }
   0x1   :  { %9 = vsyncpa [#allocation7], 0 }
   0x2   :  { %10 = vsyncpa [#allocation5], 0  ;;  %s270_s12 = smov [#allocation3]   ;;  %s198_s16 = scalar_lea.hbm %s343_s0, 256 }
   0x3   :  { %s16_s13 = sshll.u32 %s270_s12, 4  ;;  %p199_p0 = scmp.ne.s32.totalorder %s343_s0, %s198_s16  ;;  %s17_s13 = int_to_ptr.vmem [resolvable:$true] %s16_s13 }
   0x4   :  { %p202_p1 = scmp.lt.u32.totalorder %s198_s16, %s343_s0 }
   0x6   :  { %p204_p2 = pnand %p202_p1, %p199_p0 }
   0x8   :  { %207 = shalt.err (!%p204_p2)
}
   0x9   :  { %s208_s21 = scalar_lea.vmem %s17_s13, 256  ;;  %p213_p4 = scmp.lt.s32.totalorder %s17_s13, %s17_s13 }
   0xa   :  { %p209_p3 = scmp.ne.s32.totalorder %s17_s13, %s208_s21  ;;  %p214_p5 = scmp.lt.s32.totalorder %s208_s21, %s208_s21 }
   0xc   :  { %p215_p6 = por %p214_p5, %p213_p4 }
   0xe   :  { %p216_p7 = pnand %p215_p6, %p209_p3 }
  0x10   :  { %219 = shalt.err (!%p216_p7)
}
  0x11   :  { %s271_s22 = smov 128   ;;  %s272_s23 = smov 8  }
  0x12   :  { %22 = dma.hbm_to_vmem [thread:$0]  %s343_s0, 256, %s17_s13, [#allocation4], %s271_s22, %s271_s22, %s272_s23  }
  0x13   :  { %s273_s26 = smov [#allocation6]   ;;  %s220_s30 = scalar_lea.hbm %s344_s1, 256 }
  0x14   :  { %s28_s27 = sshll.u32 %s273_s26, 4  ;;  %p221_p8 = scmp.ne.s32.totalorder %s344_s1, %s220_s30  ;;  %s29_s27 = int_to_ptr.vmem [resolvable:$true] %s28_s27 }
  0x15   :  { %p224_p9 = scmp.lt.u32.totalorder %s220_s30, %s344_s1 }
  0x17   :  { %p226_p10 = pnand %p224_p9, %p221_p8 }
  0x19   :  { %229 = shalt.err (!%p226_p10)
}
  0x1a   :  { %s230_s8 = scalar_lea.vmem %s29_s27, 256  ;;  %p235_p12 = scmp.lt.s32.totalorder %s29_s27, %s29_s27 }
  0x1b   :  { %p231_p11 = scmp.ne.s32.totalorder %s29_s27, %s230_s8  ;;  %p236_p13 = scmp.lt.s32.totalorder %s230_s8, %s230_s8 }
  0x1d   :  { %p237_p0 = por %p236_p13, %p235_p12 }
  0x1f   :  { %p238_p1 = pnand %p237_p0, %p231_p11 }
  0x21   :  { %241 = shalt.err (!%p238_p1)
}
  0x22   :  { %34 = dma.hbm_to_vmem [thread:$0]  %s344_s1, 256, %s29_s27, [#allocation7], %s271_s22, %s271_s22, %s272_s23  }
  0x23   :  { %264 = dma.done.wait [#allocation4], 256  }
  0x24   :  { %265 = vsyncadd [#allocation4], 4294967040 }
  0x25   :  { %266 = dma.done.wait [#allocation7], 256  }
  0x26   :  { %267 = vsyncadd [#allocation7], 4294967040  ;;  %vm55_vm0 = vcmask 130048   ;;  %v53_v0 = vld [vmem:[#allocation6] sm:$0xff]  ;;  %v54_v1 = vld [vmem:[#allocation6 + $0x8] sm:$0xff]  ;;  %s274_s12 = smov [#allocation8]  }
  0x27   :  { %v51_v2 = vld [vmem:[#allocation3] sm:$0xff]  ;;  %v189_v3 = vpack.c.bf16 %v54_v1, %v53_v0  ;;  %v52_v4 = vld [vmem:[#allocation3 + $0x8] sm:$0xff]  ;;  %s162_s1 = sshll.u32 %s274_s12, 4  ;;  %s163_s1 = int_to_ptr.vmem [resolvable:$true] %s162_s1 }
  0x28   :  { %186 = vmatprep.mubr.msk.f32.mxu0 %vm55_vm0, %v51_v2  ;;  %v177_v5 = vld [vmem:[%s345_s2] ss:$0 sm:$0xff]  ;;  %s242_s13 = scalar_lea.vmem %s163_s1, 256  ;;  %p247_p3 = scmp.lt.s32.totalorder %s163_s1, %s163_s1 }
  0x29   :  { %190 = vmatprep.subr.bf16.mxu0 %v189_v3  ;;  %p243_p2 = scmp.ne.s32.totalorder %s163_s1, %s242_s13  ;;  %p248_p4 = scmp.lt.s32.totalorder %s242_s13, %s242_s13 }
  0x2a   :  { %192 = vmatpush3.bf16.msra.mxu0 %v189_v3 }
  0x2b   :  { %p249_p5 = por %p248_p4, %p247_p3 }
  0x2d   :  { %187 = vmatmul.mubr.msk.f32.vlgmr.msra.gmra.mrb[0].mxu0 %vm55_vm0, %v52_v4  ;;  %p250_p6 = pnand %p249_p5, %p243_p2 }
 0x100   :  { %v188_v6 = vpop.f32.mrb[0].mxu0 }
 0x101   :  { %v154_v7 = vadd.f32 %v188_v6, %v177_v5  ;;  %v128_v8 = vpop.f32.mrb[1].mxu0 }
 0x102   :  { %v153_v9 = vadd.f32 %v177_v5, %v128_v8 }
 0x103   :  { %156 = vst [vmem:[#allocation8 + $0x8] sm:$0xff] %v154_v7 }
 0x104   :  { %155 = vst [vmem:[#allocation8] sm:$0xff] %v153_v9 }
 0x105   :  { %253 = shalt.err (!%p250_p6)
}
 0x106   :  { %s254_s2 = scalar_lea.hbm %s346_s3, 256 }
 0x107   :  { %p255_p7 = scmp.ne.s32.totalorder %s346_s3, %s254_s2  ;;  %p258_p8 = scmp.lt.u32.totalorder %s254_s2, %s346_s3 }
 0x109   :  { %p260_p9 = pnand %p258_p8, %p255_p7 }
 0x10b   :  { %263 = shalt.err (!%p260_p9)
}
 0x10c   :  { %168 = dma.vmem_to_hbm [thread:$0]  %s163_s1, 256, %s346_s3, [#allocation5], %s271_s22, %s271_s22, %s272_s23  }
 0x10d   :  { %268 = dma.done.wait [#allocation5], 256  }
 0x10e   :  { %269 = vsyncadd [#allocation5], 4294967040 }
 0x10f   :  { %172 = vsyncpa [#allocation4], 1 }
 0x110   :  { %173 = vsyncpa [#allocation7], 1 }
 0x111   :  { %174 = vsyncpa [#allocation5], 1 }

</bundles_post_ra>
